<compile_context>
chip_gen: v6e
topology: v6e:2x2x1
jax: 0.10.0
libtpu: 0.0.40
codegen_flags: <defaults>
</compile_context>

<pallas_src>
import jax
import jax.numpy as jnp
from jax.experimental import pallas as pl
from jax.experimental.pallas import tpu as pltpu


def _round_up(x, m):
    return ((x + m - 1) // m) * m


def _cdiv(a, b):
    return (a + b - 1) // b


def _min_sublane(dtype):
    # Minimum second-minor block dim: 8 for 32-bit, 16 for bf16, 32 for int8.
    return max(8, 32 // jnp.dtype(dtype).itemsize)


# ---------------------------------------------------------------------------
# Kernels
# ---------------------------------------------------------------------------

def _ffn_kernel(x_ref, w1t_ref, b1_ref, w2t_ref, b2_ref, o_ref):
    """Resident-weight path. One (tm, Hp) row tile:
       out = x + (ReLU(x @ W1t + b1) @ W2t + b2)."""
    x = x_ref[...]
    xm = x if x.dtype == w1t_ref.dtype else x.astype(w1t_ref.dtype)
    h = jnp.dot(xm, w1t_ref[...], preferred_element_type=jnp.float32)
    h = jnp.maximum(h + b1_ref[...], 0.0)                   # bias + ReLU in f32
    y = jnp.dot(h.astype(w2t_ref.dtype), w2t_ref[...],
                preferred_element_type=jnp.float32)
    y = y + b2_ref[...] + x.astype(jnp.float32)             # bias + residual in f32
    # TODO(synk): dropout1/dropout2 are identity in eval mode; training-mode
    # dropout (pltpu.prng_*) is not implemented here.
    o_ref[...] = y.astype(o_ref.dtype)


def _ffn_kernel_ktiled(x_ref, w1t_ref, b1_ref, w2t_ref, b2_ref, o_ref, acc_ref):
    """Hidden-dim-tiled path for widths whose resident weights would not fit
    VMEM.  Grid = (row_tiles, k_tiles); k tiles the intermediate dimension and
    is the reduction ("arbitrary") axis."""
    k = pl.program_id(1)

    @pl.when(k == 0)
    def _():
        acc_ref[...] = jnp.zeros_like(acc_ref)

    x = x_ref[...]
    xm = x if x.dtype == w1t_ref.dtype else x.astype(w1t_ref.dtype)
    h = jnp.dot(xm, w1t_ref[...], preferred_element_type=jnp.float32)   # (tm, kt)
    h = jnp.maximum(h + b1_ref[...], 0.0)
    acc_ref[...] += jnp.dot(h.astype(w2t_ref.dtype), w2t_ref[...],
                            preferred_element_type=jnp.float32)

    @pl.when(k == pl.num_programs(1) - 1)
    def _():
        o_ref[...] = (acc_ref[...] + b2_ref[...]
                      + x.astype(jnp.float32)).astype(o_ref.dtype)


# ---------------------------------------------------------------------------
# Parameter prep (one-time, hoisted)
# ---------------------------------------------------------------------------

def prepare_params(w1, b1, w2, b2, weight_dtype=jnp.bfloat16):
    """Transpose, pad hidden dim to a multiple of 128 (lane width), cast
    weights to bf16.  Biases stay f32.  Zero padding preserves the math on
    the first H output columns."""
    H = w1.shape[0]
    Hp = _round_up(H, 128)
    pad = Hp - H

    def prep_w(w):
        wt = w.T                      # (in, out): x @ wt == x @ w.T
        return jnp.pad(wt, ((0, pad), (0, pad))).astype(weight_dtype)

    def prep_b(b):
        return jnp.pad(b.astype(jnp.float32), (0, pad)).reshape(1, Hp)

    return prep_w(w1), prep_b(b1), prep_w(w2), prep_b(b2)


# ---------------------------------------------------------------------------
# Tiling / VMEM sizing
# ---------------------------------------------------------------------------

_VMEM_CAPS = None


def _vmem_caps():
    """(vmem_limit_cap, footprint_budget) in bytes, generation-aware."""
    global _VMEM_CAPS
    if _VMEM_CAPS is None:
        try:
            cap = int(pltpu.get_tpu_info().vmem_capacity_bytes)
        except Exception:
            cap = 64 * 1024 * 1024          # conservative: v7x per-TensorCore VMEM
        limit_cap = max(cap - 8 * 1024 * 1024, 32 * 1024 * 1024)  # Mosaic headroom
        budget = int(0.85 * limit_cap)      # ~47 MiB on v7x, ~100 MiB on v5e/v6e
        _VMEM_CAPS = (limit_cap, budget)
    return _VMEM_CAPS


def _vmem_footprint(tm, hp, kt, w_itemsize, x_itemsize):
    weights = 2 * hp * kt * w_itemsize * 2       # W1t(Hp,kt) + W2t(kt,Hp), 2 bufs
    biases = (kt + hp) * 4 * 2
    x_io = 2 * 2 * tm * hp * x_itemsize          # x in + out tiles, double-buffered
    acc = tm * hp * 4                            # f32 result / accumulator tile
    interm = 2 * tm * kt * 4                     # f32 h + cast-copy headroom
    return weights + biases + x_io + acc + interm


def _choose_tiling(M, Hp, x_itemsize, w_itemsize, budget, min_tm):
    """Pick (tm, kt).  Prefer fully-resident weights (kt == Hp) with the
    largest row tile that fits; fall back to hidden-dim tiling for wide Hp."""
    kt_candidates = [c for c in range(Hp, 127, -128) if Hp % c == 0] or [Hp]
    tm, kt = None, None
    for cand_kt in kt_candidates:
        t = 8192
        while t > 512 and _vmem_footprint(t, Hp, cand_kt, w_itemsize, x_itemsize) > budget:
            t //= 2
        if _vmem_footprint(t, Hp, cand_kt, w_itemsize, x_itemsize) <= budget:
            tm, kt = t, cand_kt
            break
    if tm is None:                                # last resort; vmem_limit guards it
        tm, kt = 512, kt_candidates[-1]

    # Clamp to the problem, keeping >= 2 row tiles when possible so the
    # "parallel" axis feeds both v7x TensorCores.
    if tm >= M:
        if M >= 2 * min_tm:
            tm = _round_up(_cdiv(M, 2), min_tm)
        else:
            tm = max(M, 1)                        # single full-extent block
    return tm, kt


# ---------------------------------------------------------------------------
# Wrapper
# ---------------------------------------------------------------------------

@jax.jit
def pointwise_feedforward(x, w1t, b1, w2t, b2):
    """x: (B, S, H) f32 or bf16 activations (pass bf16 to halve HBM traffic on
    these memory-bound shapes).  w1t/w2t: (Hp, Hp) padded transposed bf16
    weights; b1/b2: (1, Hp) f32 padded biases — see prepare_params()."""
    B, S, H = x.shape
    Hp = w1t.shape[0]
    M = B * S
    x_itemsize = jnp.dtype(x.dtype).itemsize
    w_itemsize = jnp.dtype(w1t.dtype).itemsize
    limit_cap, budget = _vmem_caps()
    min_tm = _min_sublane(x.dtype)

    tm, kt = _choose_tiling(M, Hp, x_itemsize, w_itemsize, budget, min_tm)

    # Hot path: no row pad / row slice (ragged last row tile is masked by
    # Pallas); columns only padded when H is not already lane-aligned.
    x2d = x.reshape(M, H)
    if Hp != H:
        x2d = jnp.pad(x2d, ((0, 0), (0, Hp - H)))

    fp = _vmem_footprint(tm, Hp, kt, w_itemsize, x_itemsize)
    vmem_limit = int(min(limit_cap, max(32 * 1024 * 1024, int(1.25 * fp))))

    if kt == Hp:
        # Weights fully resident.  Constant index_map -> fetched once; single-
        # buffer them when the default double-buffer would waste real VMEM.
        single_buf = 2 * (2 * Hp * Hp * w_itemsize) > 8 * 1024 * 1024
        wkw = dict(pipeline_mode=pl.Buffered(buffer_count=1)) if single_buf else {}
        grid = (_cdiv(M, tm),)
        kernel = _ffn_kernel
        in_specs = [
            pl.BlockSpec((tm, Hp), lambda i: (i, 0)),          # x row tile (streamed)
            pl.BlockSpec((Hp, Hp), lambda i: (0, 0), **wkw),   # W1^T (resident)
            pl.BlockSpec((1, Hp), lambda i: (0, 0), **wkw),    # b1
            pl.BlockSpec((Hp, Hp), lambda i: (0, 0), **wkw),   # W2^T (resident)
            pl.BlockSpec((1, Hp), lambda i: (0, 0), **wkw),    # b2
        ]
        out_specs = pl.BlockSpec((tm, Hp), lambda i: (i, 0))
        scratch = []
        dims = ("parallel",)
    else:
        # Hidden-dim tiled fallback for very wide Hp (e.g. >= ~2K bf16 on v7x).
        grid = (_cdiv(M, tm), Hp // kt)
        kernel = _ffn_kernel_ktiled
        in_specs = [
            pl.BlockSpec((tm, Hp), lambda i, k: (i, 0)),       # x row tile (reused across k)
            pl.BlockSpec((Hp, kt), lambda i, k: (0, k)),       # W1^T column block
            pl.BlockSpec((1, kt), lambda i, k: (0, k)),        # b1 block
            pl.BlockSpec((kt, Hp), lambda i, k: (k, 0)),       # W2^T row block
            pl.BlockSpec((1, Hp), lambda i, k: (0, 0)),        # b2
        ]
        out_specs = pl.BlockSpec((tm, Hp), lambda i, k: (i, 0))
        scratch = [pltpu.VMEM((tm, Hp), jnp.float32)]
        dims = ("parallel", "arbitrary")

    out2d = pl.pallas_call(
        kernel,
        out_shape=jax.ShapeDtypeStruct((M, Hp), x.dtype),
        grid_spec=pltpu.PrefetchScalarGridSpec(
            num_scalar_prefetch=0,
            grid=grid,
            in_specs=in_specs,
            out_specs=out_specs,
            scratch_shapes=scratch,
        ),
        compiler_params=pltpu.CompilerParams(
            dimension_semantics=dims,
            vmem_limit_bytes=vmem_limit,
        ),
    )(x2d, w1t, b1, w2t, b2)

    if Hp != H:
        out2d = out2d[:, :H]
    return out2d.reshape(B, S, H)


# ---------------------------------------------------------------------------
# Demo / self-check
# ---------------------------------------------------------------------------

def init_params(key, hidden_units):
    # Deterministic init mimicking PyTorch Conv1d default (uniform +-1/sqrt(fan_in)).
    k1, k2, k3, k4 = jax.random.split(key, 4)
    bound = 1.0 / (hidden_units ** 0.5)
    w1 = jax.random.uniform(k1, (hidden_units, hidden_units), jnp.float32, -bound, bound)
    b1 = jax.random.uniform(k2, (hidden_units,), jnp.float32, -bound, bound)
    w2 = jax.random.uniform(k3, (hidden_units, hidden_units), jnp.float32, -bound, bound)
    b2 = jax.random.uniform(k4, (hidden_units,), jnp.float32, -bound, bound)
    return w1, b1, w2, b2


if __name__ == "__main__":
    key = jax.random.PRNGKey(0)
    k_x, k_p = jax.random.split(key)

    B, S, H = 2, 8, 32  # batch, seq, hidden_units
    x = jax.random.normal(k_x, (B, S, H), jnp.float32)
    w1, b1, w2, b2 = init_params(k_p, H)

    # Hoisted one-time parameter preparation (transpose + pad + bf16 cast).
    w1t_p, b1_p, w2t_p, b2_p = prepare_params(w1, b1, w2, b2)

    out = pointwise_feedforward(x, w1t_p, b1_p, w2t_p, b2_p)
    out = jax.block_until_ready(out)

    # Reference with matching bf16-matmul / f32-accumulate precision (tight check).
    x2d = x.reshape(-1, H)
    h_ref = jnp.maximum(
        jnp.dot(x2d.astype(jnp.bfloat16), w1.T.astype(jnp.bfloat16),
                preferred_element_type=jnp.float32) + b1, 0.0)
    y_ref = jnp.dot(h_ref.astype(jnp.bfloat16), w2.T.astype(jnp.bfloat16),
                    preferred_element_type=jnp.float32) + b2
    ref_bf16 = (x2d + y_ref).reshape(B, S, H)
    assert jnp.allclose(out, ref_bf16, atol=5e-3, rtol=5e-3), "mismatch vs bf16 reference"

    # Loose sanity check vs pure-f32 module semantics (tolerance = bf16 matmul error).
    ref_f32 = x + (jnp.maximum(x @ w1.T + b1, 0.0) @ w2.T + b2)
    assert jnp.allclose(out, ref_f32, atol=1e-1, rtol=1e-1), "mismatch vs f32 reference"

    # bf16 activation-I/O path (halves HBM traffic on memory-bound shapes).
    out_bf16 = pointwise_feedforward(x.astype(jnp.bfloat16), w1t_p, b1_p, w2t_p, b2_p)
    out_bf16 = jax.block_until_ready(out_bf16)
    assert jnp.allclose(out_bf16.astype(jnp.float32), ref_f32, atol=1e-1, rtol=1e-1), \
        "mismatch on bf16-activation path"

    print("KERNEL_OK")
</pallas_src>

<mosaic_0001>
module attributes {stable_mosaic.version = 11 : i64} {
  func.func @_ffn_kernel(%arg0: i32, %arg1: memref<8x128xf32, #tpu.memory_space<vmem>>, %arg2: memref<128x128xbf16, #tpu.memory_space<vmem>>, %arg3: memref<1x128xf32, #tpu.memory_space<vmem>>, %arg4: memref<128x128xbf16, #tpu.memory_space<vmem>>, %arg5: memref<1x128xf32, #tpu.memory_space<vmem>>, %arg6: memref<8x128xf32, #tpu.memory_space<vmem>>) attributes {dimension_semantics = [#tpu.dimension_semantics<parallel>], iteration_bounds = array<i64: 2>, scalar_prefetch = 0 : i64, scratch_operands = 0 : i64, tpu.core_type = #tpu.core_type<tc>, window_params = [{transform_indices = @transform_0, window_bounds = array<i64: 8, 128>}, {pipeline_mode = #tpu.pipeline_mode<synchronous>, transform_indices = @transform_1, window_bounds = array<i64: 128, 128>}, {pipeline_mode = #tpu.pipeline_mode<synchronous>, transform_indices = @transform_2, window_bounds = array<i64: 1, 128>}, {pipeline_mode = #tpu.pipeline_mode<synchronous>, transform_indices = @transform_3, window_bounds = array<i64: 128, 128>}, {pipeline_mode = #tpu.pipeline_mode<synchronous>, transform_indices = @transform_4, window_bounds = array<i64: 1, 128>}, {transform_indices = @transform_5, window_bounds = array<i64: 8, 128>}]} {
    %c0 = arith.constant 0 : index
    %c0_0 = arith.constant 0 : index
    %0 = vector.load %arg1[%c0, %c0_0] : memref<8x128xf32, #tpu.memory_space<vmem>>, vector<8x128xf32>
    %1 = arith.truncf %0 : vector<8x128xf32> to vector<8x128xbf16>
    %c0_1 = arith.constant 0 : index
    %c0_2 = arith.constant 0 : index
    %2 = vector.load %arg2[%c0_1, %c0_2] : memref<128x128xbf16, #tpu.memory_space<vmem>>, vector<128x128xbf16>
    %cst = arith.constant dense<0.000000e+00> : vector<8x128xf32>
    %3 = tpu.matmul %1, %2, %cst {dimension_numbers = #tpu.dot_dimension_numbers<[1], [0], [0], [1], [0, 0, 1, 1], [], []>} : vector<8x128xbf16>, vector<128x128xbf16>, vector<8x128xf32> -> vector<8x128xf32>
    %c0_3 = arith.constant 0 : index
    %c0_4 = arith.constant 0 : index
    %4 = vector.load %arg3[%c0_3, %c0_4] : memref<1x128xf32, #tpu.memory_space<vmem>>, vector<1x128xf32>
    %5 = vector.broadcast %4 : vector<1x128xf32> to vector<8x128xf32>
    %6 = arith.addf %3, %5 : vector<8x128xf32>
    %cst_5 = arith.constant 0.000000e+00 : f32
    %7 = vector.broadcast %cst_5 : f32 to vector<8x128xf32>
    %8 = arith.maximumf %6, %7 : vector<8x128xf32>
    %9 = arith.truncf %8 : vector<8x128xf32> to vector<8x128xbf16>
    %c0_6 = arith.constant 0 : index
    %c0_7 = arith.constant 0 : index
    %10 = vector.load %arg4[%c0_6, %c0_7] : memref<128x128xbf16, #tpu.memory_space<vmem>>, vector<128x128xbf16>
    %cst_8 = arith.constant dense<0.000000e+00> : vector<8x128xf32>
    %11 = tpu.matmul %9, %10, %cst_8 {dimension_numbers = #tpu.dot_dimension_numbers<[1], [0], [0], [1], [0, 0, 1, 1], [], []>} : vector<8x128xbf16>, vector<128x128xbf16>, vector<8x128xf32> -> vector<8x128xf32>
    %c0_9 = arith.constant 0 : index
    %c0_10 = arith.constant 0 : index
    %12 = vector.load %arg5[%c0_9, %c0_10] : memref<1x128xf32, #tpu.memory_space<vmem>>, vector<1x128xf32>
    %13 = vector.broadcast %12 : vector<1x128xf32> to vector<8x128xf32>
    %14 = arith.addf %11, %13 : vector<8x128xf32>
    %15 = arith.addf %14, %0 : vector<8x128xf32>
    %c0_11 = arith.constant 0 : index
    %c0_12 = arith.constant 0 : index
    %16 = vector.load %arg6[%c0_11, %c0_12] : memref<8x128xf32, #tpu.memory_space<vmem>>, vector<8x128xf32>
    tpu.vector_store %arg6[%c0_11, %c0_12], %15 {strides = array<i32>} : memref<8x128xf32, #tpu.memory_space<vmem>>, vector<8x128xf32>,
    return
  }
  func.func @transform_0(%arg0: i32) -> (i32, i32) {
    %c0_i32 = arith.constant 0 : i32
    %c0_i32_0 = arith.constant 0 : i32
    return %arg0, %c0_i32 : i32, i32
  }
  func.func @transform_1(%arg0: i32) -> (i32, i32) {
    %c0_i32 = arith.constant 0 : i32
    %c0_i32_0 = arith.constant 0 : i32
    %c0_i32_1 = arith.constant 0 : i32
    return %c0_i32, %c0_i32_0 : i32, i32
  }
  func.func @transform_2(%arg0: i32) -> (i32, i32) {
    %c0_i32 = arith.constant 0 : i32
    %c0_i32_0 = arith.constant 0 : i32
    %c0_i32_1 = arith.constant 0 : i32
    return %c0_i32, %c0_i32_0 : i32, i32
  }
  func.func @transform_3(%arg0: i32) -> (i32, i32) {
    %c0_i32 = arith.constant 0 : i32
    %c0_i32_0 = arith.constant 0 : i32
    %c0_i32_1 = arith.constant 0 : i32
    return %c0_i32, %c0_i32_0 : i32, i32
  }
  func.func @transform_4(%arg0: i32) -> (i32, i32) {
    %c0_i32 = arith.constant 0 : i32
    %c0_i32_0 = arith.constant 0 : i32
    %c0_i32_1 = arith.constant 0 : i32
    return %c0_i32, %c0_i32_0 : i32, i32
  }
  func.func @transform_5(%arg0: i32) -> (i32, i32) {
    %c0_i32 = arith.constant 0 : i32
    %c0_i32_0 = arith.constant 0 : i32
    return %arg0, %c0_i32 : i32, i32
  }
}

</mosaic_0001>

<bundles_post_ra>
// kernel: pointwise_feedforward.1
= control target key start
LH: loop header
LB: loop body
LE: loop exit
PB: predicated region body
PF: predicated region fallthrough
CT: control target
= control target key end

     0   :  { %10 = vsyncpa [#allocation3], 0  ;;  %s871_s0 = inlined_call_operand.vmem [shape: f32[16,128], index: 0, kind: input, shape index: {}]   ;;  %s872_s1 = inlined_call_operand.hbm [shape: bf16[128,128], index: 1, kind: input, shape index: {}]   ;;  %s873_s2 = inlined_call_operand.vmem [shape: f32[1,128], index: 2, kind: input, shape index: {}]   ;;  %s874_s3 = inlined_call_operand.hbm [shape: bf16[128,128], index: 3, kind: input, shape index: {}]   ;;  %s875_s4 = inlined_call_operand.vmem [shape: f32[1,128], index: 4, kind: input, shape index: {}]   ;;  %s876_s5 = inlined_call_operand.vmem [shape: f32[16,128], index: 5, kind: output, shape index: {}]  }
   0x1   :  { %11 = vsyncpa [#allocation5], 0  ;;  %s796_s18 = smov 0  }
   0x2 LB: > { %s802_s19 = sadd.s32 4294967295, %s758_s18   ;;  %p556_p0 = scmp.ge.s32.totalorder %s758_s18, 1  ;;  %s758_s18 = sphi %s796_s18, %s17_s18  }
   0x3   : > { %p158_p1 = scmp.lt.s32.totalorder %s758_s18, 3  ;;  %s760_s20 = smov [#allocation2]  }
   0x4   : > { %s170_s21 = sshll.u32 %s760_s20, 4  ;;  %p658_p3 = scmp.eq.s32.totalorder %s802_s19, 0  ;;  %s171_s21 = int_to_ptr.vmem [resolvable:$true] %s170_s21 }
   0x5   : > { %p806_p2 = pnand %p556_p0, %p158_p1  ;;  %s761_s23 = smov [#allocation4]  }
   0x6   : > { %s186_s24 = sshll.u32 %s761_s23, 4  ;;  %s703_s26 = scalar_lea.vmem %s171_s21, 1024  ;;  %s187_s24 = int_to_ptr.vmem [resolvable:$true] %s186_s24 }
   0x7   : > { %p651_p4 = pneg %p806_p2  ;;  %p704_p7 = scmp.ne.s32.totalorder %s171_s21, %s703_s26 }
   0x8   : > { %p711_p10 = scmp.lt.s32.totalorder %s171_s21, %s171_s21  ;;  %p712_p11 = scmp.lt.s32.totalorder %s703_s26, %s703_s26 }
   0x9   : > { %p815_p5 = pnand %p658_p3, %p651_p4 }
   0xa   : > { %p713_p12 = por %p712_p11, %p711_p10 }
   0xb   : > { %p694_p6 = pneg %p815_p5 }
   0xd   : > { %p706_p8 = pnand %p704_p7, %p694_p6 }
   0xf   : > { %p707_p9 = pneg %p706_p8 }
  0x11   : > { %p714_p13 = pnand %p713_p12, %p707_p9 }
  0x13   : > { %717 = shalt.err (!%p714_p13)
}
  0x14   : > { %s762_s27 = smov 64   ;;  %s763_s28 = smov 4  }
  0x15   : > { %654 = dma.hbm_to_vmem [thread:$0]  (!%p815_p5), %s872_s1, 1024, %s171_s21, [#allocation3], %s762_s27, %s762_s27, %s763_s28  }
  0x16   : > { %s729_s6 = scalar_lea.vmem %s187_s24, 1024  ;;  %p737_p7 = scmp.lt.s32.totalorder %s187_s24, %s187_s24 }
  0x17   : > { %p730_p0 = scmp.ne.s32.totalorder %s187_s24, %s729_s6  ;;  %p738_p8 = scmp.lt.s32.totalorder %s729_s6, %s729_s6 }
  0x19   : > { %p732_p1 = pnand %p730_p0, %p694_p6  ;;  %p739_p10 = por %p738_p8, %p737_p7 }
  0x1b   : > { %p733_p4 = pneg %p732_p1 }
  0x1d   : > { %p740_p9 = pnand %p739_p10, %p733_p4 }
  0x1f   : > { %743 = shalt.err (!%p740_p9)
}
  0x20   : > { %657 = dma.hbm_to_vmem [thread:$0]  (!%p815_p5), %s874_s3, 1024, %s187_s24, [#allocation5], %s762_s27, %s762_s27, %s763_s28  }
  0x21   : > { %212 = sbr.rel (%p806_p2) target bundleno = 473 (0x1d9), region = 40 }
  0x26   : > { %749 = dma.done.wait (%p658_p3), [#allocation3], 1024  }
  0x27   : > { %751 = vsyncadd (%p658_p3), [#allocation3], 4294966272 }
  0x28   : > { %753 = dma.done.wait (%p658_p3), [#allocation5], 1024  }
  0x29   : > { %755 = vsyncadd (%p658_p3), [#allocation5], 4294966272  ;;  %v764_v0 = vmov 0.0   ;;  %vm765_vm0 = vmmov 0   ;;  %v676_v1 = vld [vmem:[#allocation2 + $0x38] sm:$0xff]   ;;  %v677_v2 = vld [vmem:[#allocation2 + $0x30] sm:$0xff]  }
  0x2a   : > { %603 = vmatprep.subr.bf16.mxu0 %v764_v0  ;;  %619 = vmatprep.mubr.msk.bf16.mxu0 %vm765_vm0, %v764_v0  ;;  %v678_v3 = vld [vmem:[#allocation2 + $0x28] sm:$0xff]   ;;  %v684_v4 = vld [vmem:[#allocation4 + $0x38] sm:$0xff]   ;;  %v679_v5 = vld [vmem:[#allocation2 + $0x20] sm:$0xff]   ;;  %p242_p2 = scmp.lt.s32.totalorder %s802_s19, 1 }
  0x2b   : > { %623 = vmatprep.subr.bf16.mxu1 %v764_v0  ;;  %639 = vmatprep.mubr.msk.bf16.mxu1 %vm765_vm0, %v764_v0  ;;  %v685_v6 = vld [vmem:[#allocation4 + $0x30] sm:$0xff]   ;;  %v680_v7 = vld [vmem:[#allocation2 + $0x18] sm:$0xff]   ;;  %v686_v8 = vld [vmem:[#allocation4 + $0x28] sm:$0xff]  }
  0x2c   : > { %604 = vmatpush3.bf16.msra.mxu0 %v676_v1  ;;  %624 = vmatpush3.bf16.msra.mxu1 %v684_v4  ;;  %s880_s19 = smov (!%p242_p2, %s802_s19), 1  ;;  %v681_v9 = vld [vmem:[#allocation2 + $0x10] sm:$0xff]   ;;  %v687_v10 = vld [vmem:[#allocation4 + $0x20] sm:$0xff]   ;;  %v682_v11 = vld [vmem:[#allocation2 + $0x8] sm:$0xff]  }
  0x2d   : > { %605 = vmatprep.subr.bf16.mxu0 %v764_v0  ;;  %625 = vmatprep.subr.bf16.mxu1 %v764_v0  ;;  %s563_s9 = sshll.u32 %s880_s19, 3  ;;  %v688_v12 = vld [vmem:[#allocation4 + $0x18] sm:$0xff]   ;;  %v683_v13 = vld [vmem:[#allocation2] sm:$0xff]   ;;  %v689_v15 = vld [vmem:[#allocation4 + $0x10] sm:$0xff]  }
  0x2e   : > { %s245_s12 = scalar_lea.vmem %s871_s0, %s563_s9  ;;  %v690_v17 = vld [vmem:[#allocation4 + $0x8] sm:$0xff]   ;;  %v691_v18 = vld [vmem:[#allocation4] sm:$0xff]   ;;  %s249_s21 = scalar_lea.vmem %s876_s5, %s563_s9 }
  0x2f   : > { %v251_v14 = vld [vmem:[%s245_s12] sm:$0xff] }
  0x30   : > { %606 = vmatpush3.bf16.msra.mxu0 %v677_v2  ;;  %626 = vmatpush3.bf16.msra.mxu1 %v685_v6  ;;  %v252_v16 = vpack.c.bf16 %v251_v14, %v251_v14  ;;  %v565_v19 = vld [vmem:[%s873_s2] ss:$0 sm:$0xff] }
  0x31   : > { %607 = vmatprep.subr.bf16.mxu0 %v764_v0  ;;  %627 = vmatprep.subr.bf16.mxu1 %v764_v0  ;;  %v574_v27 = vld [vmem:[%s875_s4] ss:$0 sm:$0xff] }
  0x34   : > { %608 = vmatpush3.bf16.msra.mxu0 %v678_v3  ;;  %628 = vmatpush3.bf16.msra.mxu1 %v686_v8 }
  0x35   : > { %609 = vmatprep.subr.bf16.mxu0 %v764_v0  ;;  %629 = vmatprep.subr.bf16.mxu1 %v764_v0 }
  0x38   : > { %610 = vmatpush3.bf16.msra.mxu0 %v679_v5  ;;  %630 = vmatpush3.bf16.msra.mxu1 %v687_v10 }
  0x39   : > { %611 = vmatprep.subr.bf16.mxu0 %v764_v0  ;;  %631 = vmatprep.subr.bf16.mxu1 %v764_v0 }
  0x3c   : > { %612 = vmatpush3.bf16.msra.mxu0 %v680_v7  ;;  %632 = vmatpush3.bf16.msra.mxu1 %v688_v12 }
  0x3d   : > { %613 = vmatprep.subr.bf16.mxu0 %v764_v0  ;;  %633 = vmatprep.subr.bf16.mxu1 %v764_v0 }
  0x40   : > { %614 = vmatpush3.bf16.msra.mxu0 %v681_v9  ;;  %634 = vmatpush3.bf16.msra.mxu1 %v689_v15 }
  0x41   : > { %615 = vmatprep.subr.bf16.mxu0 %v764_v0  ;;  %635 = vmatprep.subr.bf16.mxu1 %v764_v0 }
  0x44   : > { %616 = vmatpush3.bf16.msra.mxu0 %v682_v11  ;;  %636 = vmatpush3.bf16.msra.mxu1 %v690_v17 }
  0x45   : > { %617 = vmatprep.subr.bf16.mxu0 %v764_v0  ;;  %637 = vmatprep.subr.bf16.mxu1 %v764_v0 }
  0x48   : > { %618 = vmatpush3.bf16.msra.mxu0 %v683_v13  ;;  %638 = vmatpush3.bf16.msra.mxu1 %v691_v18 }
  0x4b   : > { %620 = vmatmul.mubr.bf16.vlgmr.msra.gmra.mxu0 %v252_v16 }
 0x10b   : > { %v358_v20 = vpop.f32.mrf.mxu0 }
 0x10c   : > { %v359_v21 = vadd.f32 %v565_v19, %v358_v20 }
 0x10d   : > { %v621_v22 = vpop.f32.mrf.mxu0 }
 0x10e   : > { %v364_v23 = vmax.f32 %v359_v21, 0.0 }
 0x10f   : > { %v361_v24 = vpop.f32.mrf.mxu0 }
 0x110   : > { %v365_v25 = vpack.c.bf16 %v364_v23, %v364_v23 }
 0x111   : > { %v622_v26 = vpop.f32.mrf.mxu0 }
 0x112   : > { %640 = vmatmul.mubr.bf16.vlgmr.msra.gmra.mxu1 %v365_v25 }
 0x1d2   : > { %v471_v28 = vpop.f32.mrf.mxu1 }
 0x1d3   : > { %v472_v29 = vadd.f32 %v574_v27, %v471_v28 }
 0x1d4   : > { %v641_v30 = vpop.f32.mrf.mxu1 }
 0x1d5   : > { %v477_v31 = vadd.f32 %v472_v29, %v251_v14 }
 0x1d6   : > { %v474_v32 = vpop.f32.mrf.mxu1 }
 0x1d7   : > { %478 = vst [vmem:[%s249_s21] sm:$0xff] %v477_v31 }
 0x1d8   : > { %v642_v33 = vpop.f32.mrf.mxu1 }
 0x1d9 PF: > { %s17_s18 = sadd.s32 1, %s758_s18  }
 0x1da   : > { %p14_p3 = scmp.ge.s32.totalorder %s17_s18, 4  }
 0x1dc   :  { %16 = sbr.rel (!%p14_p3) target bundleno = 2 (0x2), region = 79 }
 0x1e1   :  { %498 = vsyncpa [#allocation3], 1 }
 0x1e2   :  { %500 = vsyncpa [#allocation3 + $0x1], 1 }
 0x1e3   :  { %501 = vsyncpa [#allocation5], 1 }

</bundles_post_ra>
